<compile_context>
chip_gen: v7x
topology: tpu7x:2x2x1
jax: 0.10.0
libtpu: 0.0.40
codegen_flags: <defaults>
</compile_context>

<pallas_src>
import numpy as np
import jax
import jax.numpy as jnp
from jax.experimental import pallas as pl
from jax.experimental.pallas import tpu as pltpu

_TAPS = np.array([0.05, 0.25, 0.4, 0.25, 0.05], dtype=np.float64)
_EPS = 1e-3                 # CharbonnierLoss eps
_EPS_SQ = _EPS * _EPS       # added as an f32 constant inside the kernel


def _conv_matrix(n, taps):
    """M[src, dst] s.t. (img @ M)[i, dst] = sum_o taps[o]*img[i, clamp(dst+o-2)].

    1-D conv with the gaussian taps and replicate ('edge') padding.
    """
    m = np.zeros((n, n), dtype=np.float64)
    r = len(taps) // 2
    for dst in range(n):
        for t, o in enumerate(range(-r, r + 1)):
            src = min(max(dst + o, 0), n - 1)
            m[src, dst] += taps[t]
    return m


def _laplacian_matrices(H, W):
    """laplacian(p) = p - A @ p @ B for one (H, W) plane (replicate padding)."""
    ch = _conv_matrix(H, _TAPS).T          # left-multiply conv along H
    cw = _conv_matrix(W, _TAPS)            # right-multiply conv along W
    dh = np.diag((np.arange(H) % 2 == 0).astype(np.float64))
    dw = np.diag((np.arange(W) % 2 == 0).astype(np.float64))
    A = 2.0 * (ch @ dh @ ch)               # the "4x" split between both sides
    B = 2.0 * (cw @ dw @ cw)
    return A.astype(np.float32), B.astype(np.float32)


def _edge_loss_kernel(x_ref, y_ref, a_ref, b_ref, o_ref):
    e = x_ref[0] - y_ref[0]                                   # (SB*H, LP*W)
    t = jnp.dot(e, b_ref[...], preferred_element_type=jnp.float32)
    d = e - jnp.dot(a_ref[...], t, preferred_element_type=jnp.float32)
    charb = jnp.sqrt(d * d + _EPS_SQ)
    # per-step partial sums, lanes kept dense; full reduce happens outside
    o_ref[0] = jnp.sum(charb, axis=0, keepdims=True)          # (1, LP*W)


def edge_loss(x, y):
    B, C, H, W = x.shape
    N = B * C

    # plane-packing factors: LP planes along lanes, SB planes along sublanes
    LP = max(1, 128 // W) if W < 128 else 1
    NG = -(-N // LP)
    SB = min(NG, max(1, 128 // H)) if H < 128 else 1
    G = -(-NG // SB)
    Npad = G * SB * LP
    SBH, LPW = SB * H, LP * W

    def pack(p):
        p = p.reshape(N, H, W).astype(jnp.float32)
        if Npad != N:
            p = jnp.pad(p, ((0, Npad - N), (0, 0), (0, 0)))
        return (p.reshape(G, SB, LP, H, W)
                 .transpose(0, 1, 3, 2, 4)
                 .reshape(G, SBH, LPW))

    xp, yp = pack(x), pack(y)

    A, Bw = _laplacian_matrices(H, W)
    big_a = jnp.asarray(np.kron(np.eye(SB, dtype=np.float32), A))   # (SBH, SBH)
    big_b = jnp.asarray(np.kron(np.eye(LP, dtype=np.float32), Bw))  # (LPW, LPW)

    # VMEM budget: double-buffered x/y tiles + the two conv matrices + output
    need = 4 * (4 * SBH * LPW + 2 * SBH * SBH + 2 * LPW * LPW + 2 * 8 * 128)
    vmem_limit = int(min(max(32 * 1024 * 1024, 2 * need), 112 * 1024 * 1024))

    partials = pl.pallas_call(
        _edge_loss_kernel,
        out_shape=jax.ShapeDtypeStruct((G, 1, LPW), jnp.float32),
        grid_spec=pltpu.PrefetchScalarGridSpec(
            num_scalar_prefetch=0,
            grid=(G,),
            in_specs=[
                pl.BlockSpec((1, SBH, LPW), lambda g: (g, 0, 0)),
                pl.BlockSpec((1, SBH, LPW), lambda g: (g, 0, 0)),
                pl.BlockSpec((SBH, SBH), lambda g: (0, 0)),
                pl.BlockSpec((LPW, LPW), lambda g: (0, 0)),
            ],
            out_specs=pl.BlockSpec((1, 1, LPW), lambda g: (g, 0, 0)),
        ),
        compiler_params=pltpu.CompilerParams(
            dimension_semantics=("parallel",),
            vmem_limit_bytes=vmem_limit,
        ),
    )(xp, yp, big_a, big_b)

    total = jnp.sum(partials)
    # zero-padded planes contribute exactly sqrt(eps^2) per element; remove them
    pad_elems = (Npad - N) * H * W
    if pad_elems:
        total = total - jnp.float32(pad_elems * float(np.sqrt(np.float32(_EPS_SQ))))
    return total / jnp.float32(N * H * W)


def _ref_edge_loss(x, y):
    """Pure-JAX reference mirroring the PyTorch module (for validation only)."""
    taps = jnp.asarray(_TAPS, dtype=jnp.float32)
    k2d = jnp.outer(taps, taps)
    C = x.shape[1]
    w = jnp.broadcast_to(k2d[None, None], (C, 1, 5, 5))

    def conv_gauss(img):
        p = jnp.pad(img, ((0, 0), (0, 0), (2, 2), (2, 2)), mode="edge")
        return jax.lax.conv_general_dilated(p, w, (1, 1), "VALID",
                                            feature_group_count=C)

    def lap(img):
        f = conv_gauss(img)
        nf = jnp.zeros_like(f).at[:, :, ::2, ::2].set(f[:, :, ::2, ::2] * 4.0)
        return img - conv_gauss(nf)

    d = lap(x) - lap(y)
    return jnp.mean(jnp.sqrt(d * d + _EPS * _EPS))


if __name__ == "__main__":
    key = jax.random.PRNGKey(0)
    kx, ky = jax.random.split(key)
    B, C, H, W = 2, 3, 16, 16  # module repeats the 5x5 kernel 3x -> 3 channels
    x = jax.random.normal(kx, (B, C, H, W), dtype=jnp.float32)
    y = jax.random.normal(ky, (B, C, H, W), dtype=jnp.float32)

    loss = jax.block_until_ready(edge_loss(x, y))
    ref = jax.block_until_ready(_ref_edge_loss(x, y))
    np.testing.assert_allclose(np.asarray(loss), np.asarray(ref), rtol=2e-3, atol=1e-6)
    print("KERNEL_OK")
</pallas_src>

<mosaic_0001>
module attributes {stable_mosaic.version = 11 : i64} {
  func.func @_edge_loss_kernel(%arg0: i32, %arg1: memref<1x16x128xf32, #tpu.memory_space<vmem>>, %arg2: memref<1x16x128xf32, #tpu.memory_space<vmem>>, %arg3: memref<16x16xf32, #tpu.memory_space<vmem>>, %arg4: memref<128x128xf32, #tpu.memory_space<vmem>>, %arg5: memref<1x1x128xf32, #tpu.memory_space<vmem>>) attributes {dimension_semantics = [#tpu.dimension_semantics<parallel>], iteration_bounds = array<i64: 1>, scalar_prefetch = 0 : i64, scratch_operands = 0 : i64, tpu.core_type = #tpu.core_type<tc>, window_params = [{transform_indices = @transform_0, window_bounds = array<i64: 1, 16, 128>}, {transform_indices = @transform_1, window_bounds = array<i64: 1, 16, 128>}, {pipeline_mode = #tpu.pipeline_mode<synchronous>, transform_indices = @transform_2, window_bounds = array<i64: 16, 16>}, {pipeline_mode = #tpu.pipeline_mode<synchronous>, transform_indices = @transform_3, window_bounds = array<i64: 128, 128>}, {transform_indices = @transform_4, window_bounds = array<i64: 1, 1, 128>}]} {
    %c0 = arith.constant 0 : index
    %c0_0 = arith.constant 0 : index
    %c0_1 = arith.constant 0 : index
    %0 = vector.load %arg1[%c0, %c0_0, %c0_1] : memref<1x16x128xf32, #tpu.memory_space<vmem>>, vector<1x16x128xf32>
    %1 = vector.shape_cast %0 : vector<1x16x128xf32> to vector<16x128xf32>
    %c0_2 = arith.constant 0 : index
    %c0_3 = arith.constant 0 : index
    %c0_4 = arith.constant 0 : index
    %2 = vector.load %arg2[%c0_2, %c0_3, %c0_4] : memref<1x16x128xf32, #tpu.memory_space<vmem>>, vector<1x16x128xf32>
    %3 = vector.shape_cast %2 : vector<1x16x128xf32> to vector<16x128xf32>
    %4 = arith.subf %1, %3 : vector<16x128xf32>
    %c0_5 = arith.constant 0 : index
    %c0_6 = arith.constant 0 : index
    %5 = vector.load %arg4[%c0_5, %c0_6] : memref<128x128xf32, #tpu.memory_space<vmem>>, vector<128x128xf32>
    %cst = arith.constant dense<0.000000e+00> : vector<16x128xf32>
    %6 = tpu.matmul %4, %5, %cst {dimension_numbers = #tpu.dot_dimension_numbers<[1], [0], [0], [1], [0, 0, 1, 1], [], []>} : vector<16x128xf32>, vector<128x128xf32>, vector<16x128xf32> -> vector<16x128xf32>
    %c0_7 = arith.constant 0 : index
    %c0_8 = arith.constant 0 : index
    %7 = vector.load %arg3[%c0_7, %c0_8] : memref<16x16xf32, #tpu.memory_space<vmem>>, vector<16x16xf32>
    %cst_9 = arith.constant dense<0.000000e+00> : vector<16x128xf32>
    %8 = tpu.matmul %7, %6, %cst_9 {dimension_numbers = #tpu.dot_dimension_numbers<[1], [0], [0], [1], [0, 0, 1, 1], [], []>} : vector<16x16xf32>, vector<16x128xf32>, vector<16x128xf32> -> vector<16x128xf32>
    %9 = arith.subf %4, %8 : vector<16x128xf32>
    %10 = arith.mulf %9, %9 : vector<16x128xf32>
    %cst_10 = arith.constant 9.99999997E-7 : f32
    %11 = vector.broadcast %cst_10 : f32 to vector<16x128xf32>
    %12 = arith.addf %10, %11 : vector<16x128xf32>
    %13 = math.sqrt %12 : vector<16x128xf32>
    %cst_11 = arith.constant dense<0.000000e+00> : vector<128xf32>
    %14 = vector.multi_reduction <add>, %13, %cst_11 [0] : vector<16x128xf32> to vector<128xf32>
    %15 = vector.shape_cast %14 : vector<128xf32> to vector<1x128xf32>
    %c0_12 = arith.constant 0 : index
    %c0_13 = arith.constant 0 : index
    %c0_14 = arith.constant 0 : index
    %16 = vector.load %arg5[%c0_12, %c0_13, %c0_14] : memref<1x1x128xf32, #tpu.memory_space<vmem>>, vector<1x1x128xf32>
    %17 = vector.shape_cast %16 : vector<1x1x128xf32> to vector<1x128xf32>
    %18 = vector.shape_cast %15 : vector<1x128xf32> to vector<1x1x128xf32>
    tpu.vector_store %arg5[%c0_12, %c0_13, %c0_14], %18 {strides = array<i32>} : memref<1x1x128xf32, #tpu.memory_space<vmem>>, vector<1x1x128xf32>,
    return
  }
  func.func @transform_0(%arg0: i32) -> (i32, i32, i32) {
    %c0_i32 = arith.constant 0 : i32
    %c0_i32_0 = arith.constant 0 : i32
    %c0_i32_1 = arith.constant 0 : i32
    return %arg0, %c0_i32, %c0_i32_0 : i32, i32, i32
  }
  func.func @transform_1(%arg0: i32) -> (i32, i32, i32) {
    %c0_i32 = arith.constant 0 : i32
    %c0_i32_0 = arith.constant 0 : i32
    %c0_i32_1 = arith.constant 0 : i32
    return %arg0, %c0_i32, %c0_i32_0 : i32, i32, i32
  }
  func.func @transform_2(%arg0: i32) -> (i32, i32) {
    %c0_i32 = arith.constant 0 : i32
    %c0_i32_0 = arith.constant 0 : i32
    %c0_i32_1 = arith.constant 0 : i32
    return %c0_i32, %c0_i32_0 : i32, i32
  }
  func.func @transform_3(%arg0: i32) -> (i32, i32) {
    %c0_i32 = arith.constant 0 : i32
    %c0_i32_0 = arith.constant 0 : i32
    %c0_i32_1 = arith.constant 0 : i32
    return %c0_i32, %c0_i32_0 : i32, i32
  }
  func.func @transform_4(%arg0: i32) -> (i32, i32, i32) {
    %c0_i32 = arith.constant 0 : i32
    %c0_i32_0 = arith.constant 0 : i32
    %c0_i32_1 = arith.constant 0 : i32
    return %arg0, %c0_i32, %c0_i32_0 : i32, i32, i32
  }
}

</mosaic_0001>

<bundles_post_ra>
// kernel: tpu_custom_call.1
= control target key start
LH: loop header
LB: loop body
LE: loop exit
PB: predicated region body
PF: predicated region fallthrough
CT: control target
= control target key end

     0   :  { %9 = vsyncpa [#allocation3], 0  ;;  %s648_s0 = inlined_call_operand.hbm [shape: f32[1,16,128], index: 0, kind: input, shape index: {}]   ;;  %s649_s1 = inlined_call_operand.hbm [shape: f32[1,16,128], index: 1, kind: input, shape index: {}]   ;;  %s650_s2 = inlined_call_operand.hbm [shape: f32[16,16], index: 2, kind: input, shape index: {}]   ;;  %s651_s3 = inlined_call_operand.hbm [shape: f32[128,128], index: 3, kind: input, shape index: {}]   ;;  %s652_s4 = inlined_call_operand.hbm [shape: f32[1,1,128], index: 4, kind: output, shape index: {}]  }
   0x1   :  { %10 = vsyncpa [#allocation6], 0 }
   0x2   :  { %11 = vsyncpa [#allocation9], 0 }
   0x3   :  { %12 = vsyncpa [#allocation4], 0  ;;  %s530_s15 = smov [#allocation5]   ;;  %s531_s17 = smov [#allocation2]  }
   0x4   :  { %s30_s16 = sshll.u32 %s530_s15, 4  ;;  %s18_s18 = sshll.u32 %s531_s17, 4  ;;  %s31_s16 = int_to_ptr.vmem [resolvable:$true] %s30_s16  ;;  %s562_s18 = int_to_ptr.vmem [resolvable:$true] %s18_s18 }
   0x5   :  { %s412_s21 = scalar_lea.hbm %s649_s1, 256 }
   0x6   :  { %p413_p0 = scmp.ne.s32.totalorder %s649_s1, %s412_s21  ;;  %p416_p1 = scmp.lt.u32.totalorder %s412_s21, %s649_s1 }
   0x8   :  { %p418_p2 = pnand %p416_p1, %p413_p0 }
   0xa   :  { %421 = shalt.err (!%p418_p2)
}
   0xb   :  { %s422_s26 = scalar_lea.vmem %s31_s16, 256  ;;  %p427_p4 = scmp.lt.s32.totalorder %s31_s16, %s31_s16 }
   0xc   :  { %p423_p3 = scmp.ne.s32.totalorder %s31_s16, %s422_s26  ;;  %p428_p5 = scmp.lt.s32.totalorder %s422_s26, %s422_s26 }
   0xe   :  { %p429_p6 = por %p428_p5, %p427_p4 }
  0x10   :  { %p430_p7 = pnand %p429_p6, %p423_p3 }
  0x12   :  { %433 = shalt.err (!%p430_p7)
}
  0x13   :  { %s532_s27 = smov 128   ;;  %s533_s28 = smov 8  }
  0x14   :  { %36 = dma.hbm_to_vmem [thread:$0]  %s649_s1, 256, %s31_s16, [#allocation6], %s532_s27, %s532_s27, %s533_s28  }
  0x15   :  { %s434_s7 = scalar_lea.hbm %s648_s0, 256 }
  0x16   :  { %p435_p8 = scmp.ne.s32.totalorder %s648_s0, %s434_s7  ;;  %p438_p9 = scmp.lt.u32.totalorder %s434_s7, %s648_s0 }
  0x18   :  { %p440_p10 = pnand %p438_p9, %p435_p8 }
  0x1a   :  { %443 = shalt.err (!%p440_p10)
}
  0x1b   :  { %s444_s12 = scalar_lea.vmem %s562_s18, 256  ;;  %p449_p12 = scmp.lt.s32.totalorder %s562_s18, %s562_s18 }
  0x1c   :  { %p445_p11 = scmp.ne.s32.totalorder %s562_s18, %s444_s12  ;;  %p450_p13 = scmp.lt.s32.totalorder %s444_s12, %s444_s12 }
  0x1e   :  { %p451_p0 = por %p450_p13, %p449_p12 }
  0x20   :  { %p452_p1 = pnand %p451_p0, %p445_p11 }
  0x22   :  { %455 = shalt.err (!%p452_p1)
}
  0x23   :  { %24 = dma.hbm_to_vmem [thread:$0]  %s648_s0, 256, %s562_s18, [#allocation3], %s532_s27, %s532_s27, %s533_s28  }
  0x24   :  { %s534_s14 = smov [#allocation7]   ;;  %s535_s16 = smov [#allocation8]  }
  0x25   :  { %s42_s15 = sshll.u32 %s534_s14, 4  ;;  %s54_s17 = sshll.u32 %s535_s16, 4  ;;  %s43_s15 = int_to_ptr.vmem [resolvable:$true] %s42_s15  ;;  %s599_s17 = int_to_ptr.vmem [resolvable:$true] %s54_s17 }
  0x26   :  { %s456_s21 = scalar_lea.hbm %s650_s2, 256 }
  0x27   :  { %p457_p2 = scmp.ne.s32.totalorder %s650_s2, %s456_s21  ;;  %p460_p3 = scmp.lt.u32.totalorder %s456_s21, %s650_s2 }
  0x29   :  { %p462_p4 = pnand %p460_p3, %p457_p2 }
  0x2b   :  { %465 = shalt.err (!%p462_p4)
}
  0x2c   :  { %s466_s0 = scalar_lea.vmem %s43_s15, 256  ;;  %p471_p6 = scmp.lt.s32.totalorder %s43_s15, %s43_s15 }
  0x2d   :  { %p467_p5 = scmp.ne.s32.totalorder %s43_s15, %s466_s0  ;;  %p472_p7 = scmp.lt.s32.totalorder %s466_s0, %s466_s0 }
  0x2f   :  { %p473_p8 = por %p472_p7, %p471_p6 }
  0x31   :  { %p474_p9 = pnand %p473_p8, %p467_p5 }
  0x33   :  { %477 = shalt.err (!%p474_p9)
}
  0x34   :  { %48 = dma.hbm_to_vmem [thread:$0]  %s650_s2, 256, %s43_s15, [#allocation6], %s532_s27, %s532_s27, %s533_s28  }
  0x35   :  { %s478_s5 = scalar_lea.hbm %s651_s3, 2048 }
  0x36   :  { %p479_p10 = scmp.ne.s32.totalorder %s651_s3, %s478_s5  ;;  %p482_p11 = scmp.lt.u32.totalorder %s478_s5, %s651_s3 }
  0x38   :  { %p484_p12 = pnand %p482_p11, %p479_p10 }
  0x3a   :  { %487 = shalt.err (!%p484_p12)
}
  0x3b   :  { %s488_s10 = scalar_lea.vmem %s599_s17, 2048  ;;  %p493_p0 = scmp.lt.s32.totalorder %s599_s17, %s599_s17 }
  0x3c   :  { %p489_p13 = scmp.ne.s32.totalorder %s599_s17, %s488_s10  ;;  %p494_p1 = scmp.lt.s32.totalorder %s488_s10, %s488_s10 }
  0x3e   :  { %p495_p2 = por %p494_p1, %p493_p0 }
  0x40   :  { %p496_p3 = pnand %p495_p2, %p489_p13 }
  0x42   :  { %499 = shalt.err (!%p496_p3)
}
  0x43   :  { %60 = dma.hbm_to_vmem [thread:$0]  %s651_s3, 2048, %s599_s17, [#allocation9], %s532_s27, %s532_s27, %s533_s28  }
  0x44   :  { %522 = dma.done.wait [#allocation3], 256  }
  0x45   :  { %523 = vsyncadd [#allocation3], 4294967040 }
  0x46   :  { %524 = dma.done.wait [#allocation6], 512  }
  0x47   :  { %525 = vsyncadd [#allocation6], 4294966784 }
  0x48   :  { %526 = dma.done.wait [#allocation9], 2048  }
  0x49   :  { %527 = vsyncadd [#allocation9], 4294965248  ;;  %v79_v0 = vld [vmem:[#allocation8] sm:$0xff]  ;;  %v80_v1 = vld [vmem:[#allocation8 + $0x8] sm:$0xff]  ;;  %vm172_vm0 = vcmask 130048   ;;  %s536_s3 = smov [#allocation10]  }
  0x4a   :  { %v81_v2 = vld [vmem:[#allocation8 + $0x10] sm:$0xff]  ;;  %v365_v3 = vpack.c.bf16 %v80_v1, %v79_v0  ;;  %v82_v4 = vld [vmem:[#allocation8 + $0x18] sm:$0xff]  ;;  %v83_v6 = vld [vmem:[#allocation8 + $0x20] sm:$0xff]  ;;  %s288_s27 = sshll.u32 %s536_s3, 4  ;;  %s289_s27 = int_to_ptr.vmem [resolvable:$true] %s288_s27 }
  0x4b   :  { %v369_v5 = vpack.c.bf16 %v82_v4, %v81_v2  ;;  %v84_v7 = vld [vmem:[#allocation8 + $0x28] sm:$0xff]  ;;  %v73_v9 = vld [vmem:[#allocation2] sm:$0xff]  ;;  %v75_v10 = vld [vmem:[#allocation5] sm:$0xff]  ;;  %s500_s28 = scalar_lea.vmem %s289_s27, 16  ;;  %s504_s12 = scalar_lea.vmem %s289_s27, 32 }
  0x4c   :  { %366 = vmatprep.subr.bf16.mxu0 %v365_v3  ;;  %v373_v8 = vpack.c.bf16 %v84_v7, %v83_v6  ;;  %v85_v11 = vld [vmem:[#allocation8 + $0x30] sm:$0xff]  ;;  %v86_v12 = vld [vmem:[#allocation8 + $0x38] sm:$0xff]  ;;  %v77_v13 = vsub.f32 %v73_v9, %v75_v10  ;;  %v87_v15 = vld [vmem:[#allocation8 + $0x40] sm:$0xff]  ;;  %p501_p4 = scmp.ne.s32.totalorder %s289_s27, %s500_s28  ;;  %p505_p5 = scmp.lt.s32.totalorder %s289_s27, %s289_s27 }
  0x4d   :  { %368 = vmatpush3.bf16.msra.mxu0 %v365_v3  ;;  %v377_v14 = vpack.c.bf16 %v86_v12, %v85_v11  ;;  %v88_v16 = vld [vmem:[#allocation8 + $0x48] sm:$0xff]  ;;  %v89_v18 = vld [vmem:[#allocation8 + $0x50] sm:$0xff]  ;;  %v90_v19 = vld [vmem:[#allocation8 + $0x58] sm:$0xff]  ;;  %p506_p6 = scmp.lt.s32.totalorder %s504_s12, %s500_s28 }
  0x4e   :  { %370 = vmatprep.subr.bf16.mxu0 %v369_v5  ;;  %355 = vmatprep.mubr.f32.mxu0 %v77_v13  ;;  %v381_v17 = vpack.c.bf16 %v88_v16, %v87_v15  ;;  %v385_v20 = vpack.c.bf16 %v90_v19, %v89_v18  ;;  %v91_v21 = vld [vmem:[#allocation8 + $0x60] sm:$0xff]  ;;  %v92_v22 = vld [vmem:[#allocation8 + $0x68] sm:$0xff]  ;;  %v93_v24 = vld [vmem:[#allocation8 + $0x70] sm:$0xff] }
  0x4f   :  { %v389_v23 = vpack.c.bf16 %v92_v22, %v91_v21  ;;  %v94_v25 = vld [vmem:[#allocation8 + $0x78] sm:$0xff]  ;;  %v76_v28 = vld [vmem:[#allocation5 + $0x8] sm:$0xff]  ;;  %v170_v30 = vld [vmem:[#allocation7] sm:$0xff]  ;;  %p507_p7 = por %p506_p6, %p505_p5 }
  0x50   :  { %v393_v26 = vpack.c.bf16 %v94_v25, %v93_v24  ;;  %v74_v27 = vld [vmem:[#allocation2 + $0x8] sm:$0xff]  ;;  %362 = vmatprep.mubr.msk.f32.mxu1 %vm172_vm0, %v170_v30 }
  0x51   :  { %372 = vmatpush3.bf16.msra.mxu0 %v369_v5  ;;  %v78_v29 = vsub.f32 %v74_v27, %v76_v28  ;;  %v171_v34 = vld [vmem:[#allocation7 + $0x8] sm:$0xff]  ;;  %p508_p8 = pnand %p507_p7, %p501_p4 }
  0x52   :  { %374 = vmatprep.subr.bf16.mxu0 %v373_v8 }
  0x55   :  { %376 = vmatpush3.bf16.msra.mxu0 %v373_v8 }
  0x56   :  { %378 = vmatprep.subr.bf16.mxu0 %v377_v14 }
  0x59   :  { %380 = vmatpush3.bf16.msra.mxu0 %v377_v14 }
  0x5a   :  { %382 = vmatprep.subr.bf16.mxu0 %v381_v17 }
  0x5d   :  { %384 = vmatpush3.bf16.msra.mxu0 %v381_v17 }
  0x5e   :  { %386 = vmatprep.subr.bf16.mxu0 %v385_v20 }
  0x61   :  { %388 = vmatpush3.bf16.msra.mxu0 %v385_v20 }
  0x62   :  { %390 = vmatprep.subr.bf16.mxu0 %v389_v23 }
  0x65   :  { %392 = vmatpush3.bf16.msra.mxu0 %v389_v23 }
  0x66   :  { %394 = vmatprep.subr.bf16.mxu0 %v393_v26 }
  0x69   :  { %396 = vmatpush3.bf16.msra.mxu0 %v393_v26 }
  0x6c   :  { %356 = vmatmul.mubr.f32.vlgmr.msra.gmra.mrb[0].mxu0 %v78_v29 }
 0x13f   :  { %v357_v31 = vpop.f32.mrb[0].mxu0 }
 0x140   :  { %v161_v32 = vpop.f32.mrb[1].mxu0 }
 0x141   :  { %v397_v33 = vpack.c.bf16 %v357_v31, %v161_v32 }
 0x143   :  { %398 = vmatprep.subr.bf16.mxu1 %v397_v33 }
 0x144   :  { %400 = vmatpush3.bf16.msra.mxu1 %v397_v33 }
 0x147   :  { %363 = vmatmul.mubr.msk.f32.vlgmr.msra.gmra.mrb[0].mxu1 %vm172_vm0, %v171_v34 }
 0x21a   :  { %v364_v35 = vpop.f32.mrb[0].mxu1 }
 0x21b   :  { %v255_v36 = vsub.f32 %v78_v29, %v364_v35  ;;  %v245_v37 = vpop.f32.mrb[1].mxu1 }
 0x21c   :  { %v254_v38 = vsub.f32 %v77_v13, %v245_v37 }
 0x21d   :  { %v257_v39 = vmul.f32 %v255_v36, %v255_v36 }
 0x21e   :  { %v256_v40 = vmul.f32 %v254_v38, %v254_v38 }
 0x21f   :  { %v259_v41 = vadd.f32 1e-06, %v257_v39 }
 0x220   :  { %v258_v42 = vadd.f32 1e-06, %v256_v40 }
 0x221   :  { %408 = vrsqrt.f32 %v259_v41  ;;  %vm269_vm1 = vcmp.eq.f32.partialorder %v259_v41, inf  ;;  %v272_v47 = vand.u32 2147483648, %v259_v41  ;;  %vm271_vm3 = vcmp.eq.f32.partialorder %v259_v41, 0.0 }
 0x222   :  { %410 = vrsqrt.f32 %v258_v42  ;;  %vm262_vm2 = vcmp.eq.f32.partialorder %v258_v42, inf  ;;  %v265_v48 = vand.u32 2147483648, %v258_v42  ;;  %vm264_vm4 = vcmp.eq.f32.partialorder %v258_v42, 0.0 }
 0x22b   :  { %v409_v43 = vpop.eup %408 }
 0x22c   :  { %v411_v44 = vpop.eup %410  ;;  %v268_v45 = vmul.f32 %v409_v43, %v259_v41 }
 0x22d   :  { %v261_v46 = vmul.f32 %v411_v44, %v258_v42 }
 0x22e   :  { %v270_v49 = vsel %vm269_vm1, %v259_v41, %v268_v45 }
 0x22f   :  { %v263_v50 = vsel %vm262_vm2, %v258_v42, %v261_v46  ;;  %v273_v51 = vsel %vm271_vm3, %v272_v47, %v270_v49 }
 0x230   :  { %v266_v52 = vsel %vm264_vm4, %v265_v48, %v263_v50 }
 0x231   :  { %v274_v53 = vadd.f32 %v273_v51, %v266_v52 }
 0x233   :  { %v275_v54 = vrot.slane %v274_v53, 4 }
 0x235   :  { %v276_v55 = vadd.f32 %v275_v54, %v274_v53 }
 0x237   :  { %v277_v56 = vrot.slane %v276_v55, 2 }
 0x239   :  { %v278_v57 = vadd.f32 %v277_v56, %v276_v55 }
 0x23b   :  { %v279_v58 = vrot.slane %v278_v57, 1 }
 0x23d   :  { %v280_v59 = vadd.f32 %v279_v58, %v278_v57 }
 0x23f   :  { %281 = vst [vmem:[#allocation10] sm:$0x1] %v280_v59 }
 0x240   :  { %511 = shalt.err (!%p508_p8)
}
 0x241   :  { %s512_s14 = scalar_lea.hbm %s652_s4, 16 }
 0x242   :  { %p513_p9 = scmp.ne.s32.totalorder %s652_s4, %s512_s14  ;;  %p516_p10 = scmp.lt.u32.totalorder %s512_s14, %s652_s4 }
 0x244   :  { %p518_p11 = pnand %p516_p10, %p513_p9 }
 0x246   :  { %521 = shalt.err (!%p518_p11)
}
 0x247   :  { %291 = dma.vmem_to_hbm [thread:$0]  %s289_s27, 16, %s652_s4, [#allocation4]  }
 0x248   :  { %528 = dma.done.wait [#allocation4], 16  }
 0x249   :  { %529 = vsyncadd [#allocation4], 4294967280 }
 0x24a   :  { %295 = vsyncpa [#allocation3], 1 }
 0x24b   :  { %296 = vsyncpa [#allocation6], 1 }
 0x24c   :  { %297 = vsyncpa [#allocation9], 1 }
 0x24d   :  { %298 = vsyncpa [#allocation4], 1 }

</bundles_post_ra>
